<compile_context>
chip_gen: v5e
topology: v5e:2x2
jax: 0.10.0
libtpu: 0.0.40
codegen_flags: <defaults>
</compile_context>

<pallas_src>
import math

import jax
import jax.numpy as jnp
from jax.experimental import pallas as pl
from jax.experimental.pallas import tpu as pltpu


def _round_up(x, m):
    return ((x + m - 1) // m) * m


def _vmem_budget_bytes():
    """Per-generation VMEM budget with headroom for Mosaic internal scratch."""
    cap = 64 * 1024 * 1024  # conservative default: v7x physical VMEM
    try:
        cap = int(pltpu.get_tpu_info().vmem_capacity_bytes)
    except Exception:
        pass
    # >= 16 MiB and >= 1/4 of VMEM headroom: 48 MiB on v7x, 96 MiB on v5e/v6e.
    return min(cap * 3 // 4, cap - 16 * 1024 * 1024)


def _conv1x1_kernel(x_ref, w_ref, b_ref, o_ref):
    # x_ref: (tm, C), w_ref: (C, tn), b_ref: (1, tn), o_ref: (tm, tn)
    acc = jnp.dot(x_ref[...], w_ref[...], preferred_element_type=jnp.float32)
    o_ref[...] = (acc + b_ref[...].astype(jnp.float32)).astype(o_ref.dtype)


def conv1x1_pallas(x_flat, w, b):
    """Tiled 1x1-conv-as-matmul: (M, C) @ (C, N) + (1, N) -> (M, N).

    N must already be a multiple of 128 (the caller pads small N).
    """
    M, C = x_flat.shape
    N = w.shape[1]
    itemsize = x_flat.dtype.itemsize
    budget = _vmem_budget_bytes()

    # ---- weight residency -------------------------------------------------
    w_bytes = C * N * itemsize                      # single-buffered resident
    weight_resident = w_bytes <= budget // 2
    tn = N if weight_resident else min(N, 512)      # lane-dense, 128-aligned

    # ---- M tile ------------------------------------------------------------
    tm_target = 1024 if itemsize <= 2 else 512
    tm = M if M <= tm_target else tm_target
    w_block_bytes = w_bytes if weight_resident else 2 * C * tn * itemsize
    # shrink until double-buffered x/out blocks + the weight block fit budget
    while tm > 8 and 2 * tm * (C + tn) * itemsize + w_block_bytes > budget:
        tm = max(8, tm // 2)
    # v7x megacore: guarantee >= 2 iterations along the parallel M axis.
    if tm >= M and M >= 16:
        tm = _round_up(-(-M // 2), 8)

    if weight_resident:
        # 1-D grid over M; weight/bias blocks are grid-invariant -> fetched
        # exactly once, single-buffered (Buffered(1)) to save VMEM.
        grid = (pl.cdiv(M, tm),)
        in_specs = [
            pl.BlockSpec((tm, C), lambda i: (i, 0)),
            pl.BlockSpec((C, N), lambda i: (0, 0), pipeline_mode=pl.Buffered(1)),
            pl.BlockSpec((1, N), lambda i: (0, 0), pipeline_mode=pl.Buffered(1)),
        ]
        out_specs = pl.BlockSpec((tm, N), lambda i: (i, 0))
        dim_sem = ("parallel",)
        bytes_accessed = (M * C + C * N + N + M * N) * itemsize
    else:
        # Fallback for very large weights: N is the OUTER axis so the weight
        # block changes only Nt times (C*N total weight traffic); x is the
        # re-fetched operand (Nt * M * C).  M stays the parallel axis.
        nt = pl.cdiv(N, tn)
        grid = (nt, pl.cdiv(M, tm))
        in_specs = [
            pl.BlockSpec((tm, C), lambda j, i: (i, 0)),
            pl.BlockSpec((C, tn), lambda j, i: (0, j)),
            pl.BlockSpec((1, tn), lambda j, i: (0, j)),
        ]
        out_specs = pl.BlockSpec((tm, tn), lambda j, i: (i, j))
        dim_sem = ("arbitrary", "parallel")
        bytes_accessed = (nt * M * C + C * N + nt * N + M * N) * itemsize

    cost = pl.CostEstimate(
        flops=2 * M * C * N,
        transcendentals=0,
        bytes_accessed=int(bytes_accessed),
    )

    return pl.pallas_call(
        _conv1x1_kernel,
        out_shape=jax.ShapeDtypeStruct((M, N), x_flat.dtype),
        grid_spec=pltpu.PrefetchScalarGridSpec(
            num_scalar_prefetch=0,
            grid=grid,
            in_specs=in_specs,
            out_specs=out_specs,
        ),
        compiler_params=pltpu.CompilerParams(
            dimension_semantics=dim_sem,
            vmem_limit_bytes=int(budget),
        ),
        cost_estimate=cost,
    )(x_flat, w, b)


def mim_head_forward(x, w, b, *, encoder_stride, compute_dtype=None):
    """Equivalent of MIMHead.forward.

    x: (B, S, C) with S = H*W (square feature map).
    w: (C, N) with N = encoder_stride**2 * 3 (1x1 conv weight (out,in,1,1)
       stored transposed/squeezed for the matmul form).
    b: (1, N)
    compute_dtype: optionally cast the kernel I/O (e.g. jnp.bfloat16 for bf16
       models) -- accumulation stays f32 on the MXU.
    returns: (B, 3, H*r, W*r)  (NCHW, like PyTorch)
    """
    B, S, C = x.shape
    H = math.isqrt(S)
    W = H
    assert H * W == S, f"sequence_length={S} must be a perfect square"
    r = encoder_stride
    N = r * r * 3
    assert w.shape == (C, N) and b.shape == (1, N)

    if compute_dtype is not None:
        x = x.astype(compute_dtype)
        w = w.astype(compute_dtype)
        b = b.astype(compute_dtype)

    # Lane-density: pad the output-channel dim to a multiple of 128 so stores
    # are unmasked full-lane writes.  Realistic MIM configs (r=16 -> N=768,
    # r=32 -> N=3072) need no padding; only tiny r does.
    N_pad = _round_up(N, 128)
    if N_pad != N:
        w = jnp.pad(w, ((0, 0), (0, N_pad - N)))
        b = jnp.pad(b, ((0, 0), (0, N_pad - N)))

    # 1x1 conv as a pipelined, weight-resident matmul (Pallas kernel).
    y = conv1x1_pallas(x.reshape(B * S, C), w, b)          # (B*S, N_pad)

    # Pixel shuffle: pure layout permutation (no FLOPs) in XLA glue; pad drop
    # is folded into the reshape chain (fused under jit, no standalone copy).
    # Conv output channel index = c*r*r + i*r + j (c in [0,3), i,j in [0,r)).
    # TODO(synk): fuse this permutation into the kernel's output BlockSpec
    # (block (1, 3, r, W*r) per (batch, token-row)) to save one HBM round trip
    # of the output; kept in XLA because the required (W,3,r,r)->(3,r,W*r)
    # in-register relayout has fragile Mosaic lowering for small r.
    y = y.reshape(B, H, W, N_pad)[..., :N].reshape(B, H, W, 3, r, r)
    y = jnp.transpose(y, (0, 3, 1, 4, 2, 5))               # (B, 3, H, r, W, r)
    return y.reshape(B, 3, H * r, W * r)


def _reference(x, w, b, encoder_stride):
    """Pure-JAX reference mirroring the PyTorch module semantics."""
    B, S, C = x.shape
    H = W = math.isqrt(S)
    r = encoder_stride
    y = x.astype(jnp.float32) @ w.astype(jnp.float32) + b.astype(jnp.float32)
    y = y.reshape(B, H, W, 3, r, r)
    y = jnp.transpose(y, (0, 3, 1, 4, 2, 5))
    return y.reshape(B, 3, H * r, W * r)


if __name__ == "__main__":
    mim_head = jax.jit(mim_head_forward,
                       static_argnames=("encoder_stride", "compute_dtype"))
    key = jax.random.PRNGKey(0)

    # --- Config 1: tiny (exercises the padded-N path) -----------------------
    B, S, C, r = 2, 16, 32, 2            # H = W = 4, out channels = 12
    N = r * r * 3
    k1, k2, k3, key = jax.random.split(key, 4)
    x = jax.random.normal(k1, (B, S, C), dtype=jnp.float32)
    w = jax.random.normal(k2, (C, N), dtype=jnp.float32) * 0.02
    b = jax.random.normal(k3, (1, N), dtype=jnp.float32) * 0.02

    out = jax.block_until_ready(mim_head(x, w, b, encoder_stride=r))
    ref = _reference(x, w, b, r)
    assert out.shape == (B, 3, 4 * r, 4 * r)
    assert jnp.allclose(out, ref, atol=1e-5, rtol=1e-5)

    # --- Config 2: medium (exercises weight-resident Buffered(1) + 2 M-tiles)
    B, S, C, r = 2, 196, 256, 16         # H = W = 14, out channels = 768
    N = r * r * 3
    k1, k2, k3, key = jax.random.split(key, 4)
    x = jax.random.normal(k1, (B, S, C), dtype=jnp.float32)
    w = jax.random.normal(k2, (C, N), dtype=jnp.float32) * 0.02
    b = jax.random.normal(k3, (1, N), dtype=jnp.float32) * 0.02

    out = jax.block_until_ready(mim_head(x, w, b, encoder_stride=r))
    ref = _reference(x, w, b, r)
    assert out.shape == (B, 3, 14 * r, 14 * r)
    assert jnp.allclose(out, ref, atol=1e-4, rtol=1e-4)

    print("KERNEL_OK")
</pallas_src>

<mosaic_0001>
module attributes {stable_mosaic.version = 11 : i64} {
  func.func @_conv1x1_kernel(%arg0: i32, %arg1: memref<16x32xf32, #tpu.memory_space<vmem>>, %arg2: memref<32x128xf32, #tpu.memory_space<vmem>>, %arg3: memref<1x128xf32, #tpu.memory_space<vmem>>, %arg4: memref<16x128xf32, #tpu.memory_space<vmem>>) attributes {dimension_semantics = [#tpu.dimension_semantics<parallel>], iteration_bounds = array<i64: 2>, scalar_prefetch = 0 : i64, scratch_operands = 0 : i64, tpu.core_type = #tpu.core_type<tc>, window_params = [{transform_indices = @transform_0, window_bounds = array<i64: 16, 32>}, {pipeline_mode = #tpu.pipeline_mode<synchronous>, transform_indices = @transform_1, window_bounds = array<i64: 32, 128>}, {pipeline_mode = #tpu.pipeline_mode<synchronous>, transform_indices = @transform_2, window_bounds = array<i64: 1, 128>}, {transform_indices = @transform_3, window_bounds = array<i64: 16, 128>}]} {
    %c0 = arith.constant 0 : index
    %c0_0 = arith.constant 0 : index
    %0 = vector.load %arg1[%c0, %c0_0] : memref<16x32xf32, #tpu.memory_space<vmem>>, vector<16x32xf32>
    %c0_1 = arith.constant 0 : index
    %c0_2 = arith.constant 0 : index
    %1 = vector.load %arg2[%c0_1, %c0_2] : memref<32x128xf32, #tpu.memory_space<vmem>>, vector<32x128xf32>
    %cst = arith.constant dense<0.000000e+00> : vector<16x128xf32>
    %2 = tpu.matmul %0, %1, %cst {dimension_numbers = #tpu.dot_dimension_numbers<[1], [0], [0], [1], [0, 0, 1, 1], [], []>} : vector<16x32xf32>, vector<32x128xf32>, vector<16x128xf32> -> vector<16x128xf32>
    %c0_3 = arith.constant 0 : index
    %c0_4 = arith.constant 0 : index
    %3 = vector.load %arg3[%c0_3, %c0_4] : memref<1x128xf32, #tpu.memory_space<vmem>>, vector<1x128xf32>
    %4 = vector.broadcast %3 : vector<1x128xf32> to vector<16x128xf32>
    %5 = arith.addf %2, %4 : vector<16x128xf32>
    %c0_5 = arith.constant 0 : index
    %c0_6 = arith.constant 0 : index
    %6 = vector.load %arg4[%c0_5, %c0_6] : memref<16x128xf32, #tpu.memory_space<vmem>>, vector<16x128xf32>
    tpu.vector_store %arg4[%c0_5, %c0_6], %5 {strides = array<i32>} : memref<16x128xf32, #tpu.memory_space<vmem>>, vector<16x128xf32>,
    return
  }
  func.func @transform_0(%arg0: i32) -> (i32, i32) {
    %c0_i32 = arith.constant 0 : i32
    %c0_i32_0 = arith.constant 0 : i32
    return %arg0, %c0_i32 : i32, i32
  }
  func.func @transform_1(%arg0: i32) -> (i32, i32) {
    %c0_i32 = arith.constant 0 : i32
    %c0_i32_0 = arith.constant 0 : i32
    %c0_i32_1 = arith.constant 0 : i32
    return %c0_i32, %c0_i32_0 : i32, i32
  }
  func.func @transform_2(%arg0: i32) -> (i32, i32) {
    %c0_i32 = arith.constant 0 : i32
    %c0_i32_0 = arith.constant 0 : i32
    %c0_i32_1 = arith.constant 0 : i32
    return %c0_i32, %c0_i32_0 : i32, i32
  }
  func.func @transform_3(%arg0: i32) -> (i32, i32) {
    %c0_i32 = arith.constant 0 : i32
    %c0_i32_0 = arith.constant 0 : i32
    return %arg0, %c0_i32 : i32, i32
  }
}

</mosaic_0001>

<bundles_post_ra>
// kernel: mim_head_forward.1
= control target key start
LH: loop header
LB: loop body
LE: loop exit
PB: predicated region body
PF: predicated region fallthrough
CT: control target
= control target key end

     0   :  { %s326_s12 = smov 0   ;;  %s358_s0 = inlined_call_operand.vmem [shape: f32[32,32], index: 0, kind: input, shape index: {}]   ;;  %s359_s1 = inlined_call_operand.vmem [shape: f32[32,128], index: 1, kind: input, shape index: {}]   ;;  %s360_s2 = inlined_call_operand.vmem [shape: f32[1,128], index: 2, kind: input, shape index: {}]   ;;  %s361_s3 = inlined_call_operand.vmem [shape: f32[32,128], index: 3, kind: output, shape index: {}]  }
   0x1 LB: > { %s272_s13 = sadd.s32 4294967295, %s304_s12   ;;  %p276_p0 = scmp.ge.s32.totalorder %s304_s12, 1  ;;  %s304_s12 = sphi %s326_s12, %s13_s12  }
   0x2   : > { %p138_p1 = scmp.lt.s32.totalorder %s304_s12, 3 }
   0x4   : > { %p139_p2 = pnand %p276_p0, %p138_p1 }
   0x5   : > { %s277_s18 = sshll.u32 (!%p139_p2), %s272_s13, 1 }
   0x6   : > { %142 = sbr.rel (%p139_p2) target bundleno = 149 (0x95), region = 32  ;;  %p163_p3 = scmp.lt.s32.totalorder (!%p139_p2), %s277_s18, 3 }
   0xb   : > { %v179_v0 = vld [vmem:[%s359_s1 + $0x18] sm:$0xff]  ;;  %v178_v1 = vld [vmem:[%s359_s1 + $0x10] sm:$0xff]  ;;  %v177_v2 = vld [vmem:[%s359_s1 + $0x8] sm:$0xff]  ;;  %s363_s18 = smov (!%p163_p3, %s277_s18), 3  ;;  %vm184_vm0 = vcmask 261120  }
   0xc   : > { %203 = vmatpush.msra.mxu0 %v179_v0  ;;  %285 = vmatpush.msra.mxu1 %v179_v0  ;;  %v176_v3 = vld [vmem:[%s359_s1] sm:$0xff]  ;;  %s278_s23 = sshll.u32 %s363_s18, 3 }
   0xd   : > { %s166_s26 = scalar_lea.vmem %s358_s0, %s278_s23  ;;  %v297_v6 = vld [vmem:[%s360_s2] ss:$0 sm:$0xff]  ;;  %s172_s4 = scalar_lea.vmem %s361_s3, %s278_s23 }
   0xe   : > { %204 = vmatpush.msra.mxu0 %v178_v1  ;;  %286 = vmatpush.msra.mxu1 %v178_v1  ;;  %v174_v4 = vld [vmem:[%s166_s26] sm:$0xff]  ;;  %v175_v5 = vld [vmem:[%s166_s26 + $0x8] sm:$0xff] }
  0x10   : > { %205 = vmatpush.msra.mxu0 %v177_v2  ;;  %287 = vmatpush.msra.mxu1 %v177_v2 }
  0x12   : > { %206 = vmatpush.msra.mxu0 %v176_v3  ;;  %288 = vmatpush.msra.mxu1 %v176_v3 }
  0x13   : > { %281 = vmatmul.msk.f32.vlgmr.msra.gmra.mxu0 %vm184_vm0, %v174_v4  ;;  %282 = vmatmul.msk.f32.vlgmr.msra.gmra.mxu1 %vm184_vm0, %v175_v5 }
  0x90   : > { %v208_v7 = vpop.f32.mrf.mxu0  ;;  %v211_v8 = vpop.f32.mrf.mxu1 }
  0x91   : > { %v209_v9 = vadd.f32 %v297_v6, %v208_v7  ;;  %v212_v10 = vadd.f32 %v297_v6, %v211_v8 }
  0x93   : > { %214 = vst [vmem:[%s172_s4] sm:$0xff] %v209_v9 }
  0x94   : > { %215 = vst [vmem:[%s172_s4 + $0x8] sm:$0xff] %v212_v10 }
  0x95 PF: > { %s13_s12 = sadd.s32 1, %s304_s12  }
  0x96   : > { %p10_p4 = scmp.ge.s32.totalorder %s13_s12, 4  }
  0x98   :  { %12 = sbr.rel (!%p10_p4) target bundleno = 1 (0x1), region = 62 }

</bundles_post_ra>
